<compile_context>
chip_gen: v6e
topology: v6e:2x2x1
jax: 0.10.0
libtpu: 0.0.40
codegen_flags: <defaults>
</compile_context>

<pallas_src>
import functools

import jax
import jax.numpy as jnp
from jax.experimental import pallas as pl
from jax.experimental.pallas import tpu as pltpu


def _round_up(x, m):
    return -(-x // m) * m


def _per_row_hinge(x, t, tj, margin):
    """Per-row hinge term; x/t/tj are (tile_n, D) float32 -> (tile_n, 1)."""
    eps2 = jnp.float32(1e-12)  # eps**2, eps = 1e-6 (CosineSimilarity eps)

    dot_pos = jnp.sum(t * x, axis=-1, keepdims=True)
    dot_neg = jnp.sum(tj * x, axis=-1, keepdims=True)
    x2 = jnp.maximum(jnp.sum(x * x, axis=-1, keepdims=True), eps2)
    t2 = jnp.maximum(jnp.sum(t * t, axis=-1, keepdims=True), eps2)
    tj2 = jnp.maximum(jnp.sum(tj * tj, axis=-1, keepdims=True), eps2)

    # cos = dot / (max(||a||,eps) * max(||b||,eps))
    #     = dot * rsqrt(max(||a||^2,eps^2) * max(||b||^2,eps^2))   (EUP rsqrt)
    # NOTE: clamps each norm separately (matches nn.CosineSimilarity docs for
    # the per-vector eps); differs from product-clamping only for near-zero rows.
    cos_pos = dot_pos * jax.lax.rsqrt(t2 * x2)
    cos_neg = dot_neg * jax.lax.rsqrt(tj2 * x2)

    # torch.allclose(t_j, t_label): |tj - t| <= atol + rtol * |t|
    close = jnp.all(jnp.abs(tj - t) <= (1e-8 + 1e-5 * jnp.abs(t)),
                    axis=-1, keepdims=True)
    m = jnp.where(close, -margin, margin)
    return jnp.maximum(m - cos_pos + cos_neg, 0.0)


def _hinge_kernel_resident(x_ref, tgt_ref, j_ref, partial_ref, acc_ref, *,
                           margin, n_rows, tile_n):
    """target is VMEM-resident; t_i / t_j gathered via one-hot MXU matmuls."""
    c = pl.program_id(0)                 # row-tile split (TC shard on v7x)
    i = pl.program_id(1)                 # row-tile within split (reduction)
    tiles_per_split = pl.num_programs(1)

    @pl.when(i == 0)
    def _init():
        acc_ref[...] = jnp.zeros_like(acc_ref)

    x = x_ref[...].astype(jnp.float32)            # (tile_n, D)
    tgt = tgt_ref[...].astype(jnp.float32)        # (n_rows, D), resident
    j_idx = j_ref[...]                            # (tile_n, 1) int32

    row0 = (c * tiles_per_split + i) * tile_n
    rows = row0 + jax.lax.broadcasted_iota(jnp.int32, (tile_n, 1), 0)

    # Row gathers as one-hot matmuls (exact for 0/1 weights); rows >= n_rows
    # and garbage j values from ragged blocks produce zero rows (masked below).
    col = jax.lax.broadcasted_iota(jnp.int32, (tile_n, n_rows), 1)
    t = jnp.dot((col == rows).astype(jnp.float32), tgt,
                preferred_element_type=jnp.float32)
    tj = jnp.dot((col == j_idx).astype(jnp.float32), tgt,
                 preferred_element_type=jnp.float32)

    per_row = _per_row_hinge(x, t, tj, margin)
    per_row = jnp.where(rows < n_rows, per_row, 0.0)   # mask ragged tail rows
    acc_ref[...] += jnp.sum(per_row, axis=0, keepdims=True)   # (1, 1)

    @pl.when(i == tiles_per_split - 1)
    def _finalize():
        partial_ref[...] = acc_ref[...]


def _hinge_kernel_streamed(x_ref, t_ref, tj_ref, partial_ref, acc_ref, *,
                           margin, n_rows, tile_n):
    """Fallback for large N: x / t / t_j streamed as three tiled inputs."""
    c = pl.program_id(0)
    i = pl.program_id(1)
    tiles_per_split = pl.num_programs(1)

    @pl.when(i == 0)
    def _init():
        acc_ref[...] = jnp.zeros_like(acc_ref)

    x = x_ref[...].astype(jnp.float32)
    t = t_ref[...].astype(jnp.float32)
    tj = tj_ref[...].astype(jnp.float32)

    per_row = _per_row_hinge(x, t, tj, margin)

    row0 = (c * tiles_per_split + i) * tile_n
    rows = row0 + jax.lax.broadcasted_iota(jnp.int32, (tile_n, 1), 0)
    per_row = jnp.where(rows < n_rows, per_row, 0.0)   # mask ragged tail rows

    acc_ref[...] += jnp.sum(per_row, axis=0, keepdims=True)

    @pl.when(i == tiles_per_split - 1)
    def _finalize():
        partial_ref[...] = acc_ref[...]


class MyHingeLossPallas:
    """Pallas/JAX port of MyHingeLoss (forward only)."""

    MAX_TILE_ROWS = 16384

    def __init__(self, margin, dimension):
        self.margin = float(margin)
        self.dimension = int(dimension)
        # self.M exists in the PyTorch module but is never read in forward();
        # do not materialize it (saves O(D^2) HBM and an RNG launch).
        self.M = None

        kind = ""
        try:
            kind = jax.devices()[0].device_kind.lower()
        except Exception:
            pass
        is_v7x = ("v7" in kind) or ("7x" in kind)
        try:
            vmem_cap = int(pltpu.get_tpu_info().vmem_capacity_bytes)
        except Exception:
            vmem_cap = (64 << 20) if is_v7x else (128 << 20)
        self._is_v7x = is_v7x or vmem_cap <= (64 << 20)
        self._vmem_cap = int(vmem_cap)
        # Byte budget for double-buffered blocks + f32 temporaries.
        self._tile_budget = min((24 << 20) if self._is_v7x else (48 << 20),
                                max(self._vmem_cap // 2 - (4 << 20), 8 << 20))

    def __call__(self, output, target, rng_key, force_streamed=False):
        output = jnp.asarray(output)
        target = jnp.asarray(target)
        n, d = output.shape
        if n <= 1:
            return jnp.float32(0.0)

        # Random j != i for each row (deterministic via rng_key):
        # j = (i + 1 + U[0, n-2]) mod n  -> uniform over {0..n-1} \ {i}.
        i_idx = jnp.arange(n)
        offs = jax.random.randint(rng_key, (n,), 0, n - 1)
        j_idx = ((i_idx + 1 + offs) % n).astype(jnp.int32)

        itemsize = max(jnp.dtype(output.dtype).itemsize,
                       jnp.dtype(target.dtype).itemsize)
        d_pad = _round_up(d, 128)                        # lane-padded feature dim
        row_align = 8 if itemsize >= 4 else (16 if itemsize == 2 else 32)

        # Resident path: whole `target` stays in VMEM; t_i / t_j gathered
        # in-kernel.  Gated so the resident copy is small and the one-hot
        # gather matmul (~4*n^2*d flops) stays negligible vs. HBM time.
        use_resident = (not force_streamed
                        and n <= 1024
                        and n * d_pad * 4 <= (4 << 20)
                        and 2 * n * n * d <= (1 << 30))

        n_cols_pad = _round_up(n, 128)
        if use_resident:
            fixed = 2 * n * d_pad * itemsize + n * d_pad * 4   # resident bufs + f32 cast
            per_row = (2 * d_pad * itemsize        # x, double-buffered
                       + 2 * 128 * 4               # j indices (lane-padded)
                       + 4 * d_pad * 4             # f32 temporaries
                       + 2 * n_cols_pad * 4)       # one-hot matrices
        else:
            fixed = 0
            per_row = 6 * d_pad * itemsize + 4 * d_pad * 4

        avail = max(self._tile_budget - fixed, 2 << 20)
        tile_n = max(avail // per_row, row_align)
        tile_n = min(tile_n, _round_up(n, row_align), self.MAX_TILE_ROWS)
        tile_n = int(max((tile_n // row_align) * row_align, row_align))

        # 2-way split only on v7x (2 TensorCores) and only with >= 2 full tiles.
        num_splits = 2 if (self._is_v7x and n >= 2 * tile_n) else 1
        tiles_per_split = -(-n // (num_splits * tile_n))

        vmem_limit = int(min(max(fixed + per_row * tile_n + (4 << 20), 32 << 20),
                             self._vmem_cap - (4 << 20)))

        row_spec = lambda c, i: (c * tiles_per_split + i, 0)
        out_spec = pl.BlockSpec((1, 1), lambda c, i: (c, 0))
        cparams = pltpu.CompilerParams(
            dimension_semantics=("parallel", "arbitrary"),
            vmem_limit_bytes=vmem_limit)

        if use_resident:
            kernel = functools.partial(_hinge_kernel_resident, margin=self.margin,
                                       n_rows=n, tile_n=tile_n)
            partials = pl.pallas_call(
                kernel,
                out_shape=jax.ShapeDtypeStruct((num_splits, 1), jnp.float32),
                grid_spec=pltpu.PrefetchScalarGridSpec(
                    num_scalar_prefetch=0,
                    grid=(num_splits, tiles_per_split),
                    in_specs=[
                        pl.BlockSpec((tile_n, d), row_spec),        # output (v_image)
                        pl.BlockSpec((n, d), lambda c, i: (0, 0)),  # target, resident
                        pl.BlockSpec((tile_n, 1), row_spec),        # j indices
                    ],
                    out_specs=out_spec,
                    scratch_shapes=[pltpu.VMEM((1, 1), jnp.float32)],
                ),
                compiler_params=cparams,
                cost_estimate=pl.CostEstimate(
                    flops=int(13 * n * d + 4 * n * n * d),
                    transcendentals=int(2 * n),
                    bytes_accessed=int(2 * n * d * itemsize + 4 * n + 4 * num_splits)),
            )(output, target, j_idx.reshape(n, 1))
        else:
            # TODO(synk): the large-N fallback still gathers t_j = target[j] in
            # the wrapper (one extra N*D HBM round-trip); an in-kernel manual
            # DMA row-gather from `target` (memory_space=pl.ANY) would remove it.
            t_j = jnp.take(target, j_idx, axis=0)
            kernel = functools.partial(_hinge_kernel_streamed, margin=self.margin,
                                       n_rows=n, tile_n=tile_n)
            partials = pl.pallas_call(
                kernel,
                out_shape=jax.ShapeDtypeStruct((num_splits, 1), jnp.float32),
                grid_spec=pltpu.PrefetchScalarGridSpec(
                    num_scalar_prefetch=0,
                    grid=(num_splits, tiles_per_split),
                    in_specs=[
                        pl.BlockSpec((tile_n, d), row_spec),   # output (v_image)
                        pl.BlockSpec((tile_n, d), row_spec),   # target (t_label)
                        pl.BlockSpec((tile_n, d), row_spec),   # t_j
                    ],
                    out_specs=out_spec,
                    scratch_shapes=[pltpu.VMEM((1, 1), jnp.float32)],
                ),
                compiler_params=cparams,
                cost_estimate=pl.CostEstimate(
                    flops=int(13 * n * d),
                    transcendentals=int(2 * n),
                    bytes_accessed=int(3 * n * d * itemsize + 4 * num_splits)),
            )(output, target, t_j)

        return jnp.sum(partials) / jnp.float32(n)


def _reference_jax(output, target, j_idx, margin):
    """Plain-JAX per-row reference for sanity checking."""
    eps = 1e-6

    def cos(a, b):
        return jnp.dot(a, b) / (jnp.maximum(jnp.linalg.norm(a), eps)
                                * jnp.maximum(jnp.linalg.norm(b), eps))

    n = output.shape[0]
    loss = 0.0
    for i in range(n):
        x = output[i]
        t = target[i]
        tj = target[int(j_idx[i])]
        close = bool(jnp.all(jnp.abs(tj - t) <= (1e-8 + 1e-5 * jnp.abs(t))))
        m = -margin if close else margin
        loss += jnp.maximum(m - cos(t, x) + cos(tj, x), 0.0)
    return loss / n


if __name__ == "__main__":
    key = jax.random.PRNGKey(0)
    k_out, k_tgt, k_j, k_out2, k_tgt2, k_j2, k_j3 = jax.random.split(key, 7)

    margin = 0.5

    # Case 1: batch of 8 (image, label) embedding pairs, hidden=32.
    N, D = 8, 32
    output = jax.random.normal(k_out, (N, D), dtype=jnp.float32)
    target = jax.random.normal(k_tgt, (N, D), dtype=jnp.float32)

    mod = MyHingeLossPallas(margin=margin, dimension=D)
    loss = jax.block_until_ready(mod(output, target, k_j))

    offs = jax.random.randint(k_j, (N,), 0, N - 1)
    j_idx = (jnp.arange(N) + 1 + offs) % N
    ref = _reference_jax(output, target, j_idx, margin)
    assert jnp.allclose(loss, ref, rtol=1e-5, atol=1e-6), (loss, ref)

    # Case 2: non-tile-aligned batch -> exercises the ragged-block mask path.
    N2, D2 = 13, 32
    output2 = jax.random.normal(k_out2, (N2, D2), dtype=jnp.float32)
    target2 = jax.random.normal(k_tgt2, (N2, D2), dtype=jnp.float32)
    loss2 = jax.block_until_ready(mod(output2, target2, k_j2))

    offs2 = jax.random.randint(k_j2, (N2,), 0, N2 - 1)
    j_idx2 = (jnp.arange(N2) + 1 + offs2) % N2
    ref2 = _reference_jax(output2, target2, j_idx2, margin)
    assert jnp.allclose(loss2, ref2, rtol=1e-5, atol=1e-6), (loss2, ref2)

    # Case 3: force the streamed (large-N fallback) path on the same shape.
    loss3 = jax.block_until_ready(
        mod(output2, target2, k_j3, force_streamed=True))
    offs3 = jax.random.randint(k_j3, (N2,), 0, N2 - 1)
    j_idx3 = (jnp.arange(N2) + 1 + offs3) % N2
    ref3 = _reference_jax(output2, target2, j_idx3, margin)
    assert jnp.allclose(loss3, ref3, rtol=1e-5, atol=1e-6), (loss3, ref3)

    print("KERNEL_OK")
</pallas_src>

<mosaic_0001>
module attributes {stable_mosaic.version = 11 : i64} {
  func.func @_hinge_kernel_resident(%arg0: i32, %arg1: i32, %arg2: memref<8x32xf32, #tpu.memory_space<vmem>>, %arg3: memref<8x32xf32, #tpu.memory_space<vmem>>, %arg4: memref<8x1xi32, #tpu.memory_space<vmem>>, %arg5: memref<1x1xf32, #tpu.memory_space<vmem>>, %arg6: memref<1x1xf32, #tpu.memory_space<vmem>>) attributes {dimension_semantics = [#tpu.dimension_semantics<parallel>, #tpu.dimension_semantics<arbitrary>], iteration_bounds = array<i64: 1, 1>, scalar_prefetch = 0 : i64, scratch_operands = 1 : i64, tpu.core_type = #tpu.core_type<tc>, window_params = [{transform_indices = @transform_0, window_bounds = array<i64: 8, 32>}, {pipeline_mode = #tpu.pipeline_mode<synchronous>, transform_indices = @transform_1, window_bounds = array<i64: 8, 32>}, {transform_indices = @transform_2, window_bounds = array<i64: 8, 1>}, {transform_indices = @transform_3, window_bounds = array<i64: 1, 1>}]} {
    %c0_i32 = arith.constant 0 : i32
    %0 = arith.cmpi eq, %arg1, %c0_i32 : i32
    %1 = arith.extui %0 : i1 to i32
    %c0_i32_0 = arith.constant 0 : i32
    %2 = arith.cmpi ne, %1, %c0_i32_0 : i32
    scf.if %2 {
      %cst_33 = arith.constant 0.000000e+00 : f32
      %84 = vector.broadcast %cst_33 : f32 to vector<1x1xf32>
      %c0_34 = arith.constant 0 : index
      %c0_35 = arith.constant 0 : index
      %85 = vector.load %arg6[%c0_34, %c0_35] : memref<1x1xf32, #tpu.memory_space<vmem>>, vector<1x1xf32>
      tpu.vector_store %arg6[%c0_34, %c0_35], %84 {strides = array<i32>} : memref<1x1xf32, #tpu.memory_space<vmem>>, vector<1x1xf32>,
    } else {
    }
    %c0 = arith.constant 0 : index
    %c0_1 = arith.constant 0 : index
    %3 = vector.load %arg2[%c0, %c0_1] : memref<8x32xf32, #tpu.memory_space<vmem>>, vector<8x32xf32>
    %c0_2 = arith.constant 0 : index
    %c0_3 = arith.constant 0 : index
    %4 = vector.load %arg3[%c0_2, %c0_3] : memref<8x32xf32, #tpu.memory_space<vmem>>, vector<8x32xf32>
    %c0_4 = arith.constant 0 : index
    %c0_5 = arith.constant 0 : index
    %5 = vector.load %arg4[%c0_4, %c0_5] : memref<8x1xi32, #tpu.memory_space<vmem>>, vector<8x1xi32>
    %c1_i32 = arith.constant 1 : i32
    %6 = arith.muli %arg0, %c1_i32 : i32
    %7 = arith.addi %6, %arg1 : i32
    %c8_i32 = arith.constant 8 : i32
    %8 = arith.muli %7, %c8_i32 : i32
    %9 = tpu.iota {dimensions = array<i32: 0>} : vector<8x1xi32>
    %10 = vector.broadcast %8 : i32 to vector<8x1xi32>
    %11 = arith.addi %10, %9 : vector<8x1xi32>
    %12 = tpu.iota {dimensions = array<i32: 1>} : vector<8x8xi32>
    %13 = vector.broadcast %11 : vector<8x1xi32> to vector<8x8xi32>
    %14 = arith.cmpi eq, %12, %13 : vector<8x8xi32>
    %15 = arith.extui %14 : vector<8x8xi1> to vector<8x8xi32>
    %16 = arith.sitofp %15 : vector<8x8xi32> to vector<8x8xf32>
    %cst = arith.constant dense<0.000000e+00> : vector<8x32xf32>
    %17 = tpu.matmul %16, %4, %cst {dimension_numbers = #tpu.dot_dimension_numbers<[1], [0], [0], [1], [0, 0, 1, 1], [], []>} : vector<8x8xf32>, vector<8x32xf32>, vector<8x32xf32> -> vector<8x32xf32>
    %18 = vector.broadcast %5 : vector<8x1xi32> to vector<8x8xi32>
    %19 = arith.cmpi eq, %12, %18 : vector<8x8xi32>
    %20 = arith.extui %19 : vector<8x8xi1> to vector<8x8xi32>
    %21 = arith.sitofp %20 : vector<8x8xi32> to vector<8x8xf32>
    %cst_6 = arith.constant dense<0.000000e+00> : vector<8x32xf32>
    %22 = tpu.matmul %21, %4, %cst_6 {dimension_numbers = #tpu.dot_dimension_numbers<[1], [0], [0], [1], [0, 0, 1, 1], [], []>} : vector<8x8xf32>, vector<8x32xf32>, vector<8x32xf32> -> vector<8x32xf32>
    %23 = arith.mulf %17, %3 : vector<8x32xf32>
    %cst_7 = arith.constant dense<0.000000e+00> : vector<8xf32>
    %24 = vector.multi_reduction <add>, %23, %cst_7 [1] : vector<8x32xf32> to vector<8xf32>
    %25 = vector.shape_cast %24 : vector<8xf32> to vector<8x1xf32>
    %26 = arith.mulf %22, %3 : vector<8x32xf32>
    %cst_8 = arith.constant dense<0.000000e+00> : vector<8xf32>
    %27 = vector.multi_reduction <add>, %26, %cst_8 [1] : vector<8x32xf32> to vector<8xf32>
    %28 = vector.shape_cast %27 : vector<8xf32> to vector<8x1xf32>
    %29 = arith.mulf %3, %3 : vector<8x32xf32>
    %cst_9 = arith.constant dense<0.000000e+00> : vector<8xf32>
    %30 = vector.multi_reduction <add>, %29, %cst_9 [1] : vector<8x32xf32> to vector<8xf32>
    %31 = vector.shape_cast %30 : vector<8xf32> to vector<8x1xf32>
    %cst_10 = arith.constant 9.99999996E-13 : f32
    %32 = vector.broadcast %cst_10 : f32 to vector<8x1xf32>
    %33 = arith.maximumf %31, %32 : vector<8x1xf32>
    %34 = arith.mulf %17, %17 : vector<8x32xf32>
    %cst_11 = arith.constant dense<0.000000e+00> : vector<8xf32>
    %35 = vector.multi_reduction <add>, %34, %cst_11 [1] : vector<8x32xf32> to vector<8xf32>
    %36 = vector.shape_cast %35 : vector<8xf32> to vector<8x1xf32>
    %cst_12 = arith.constant 9.99999996E-13 : f32
    %37 = vector.broadcast %cst_12 : f32 to vector<8x1xf32>
    %38 = arith.maximumf %36, %37 : vector<8x1xf32>
    %39 = arith.mulf %22, %22 : vector<8x32xf32>
    %cst_13 = arith.constant dense<0.000000e+00> : vector<8xf32>
    %40 = vector.multi_reduction <add>, %39, %cst_13 [1] : vector<8x32xf32> to vector<8xf32>
    %41 = vector.shape_cast %40 : vector<8xf32> to vector<8x1xf32>
    %cst_14 = arith.constant 9.99999996E-13 : f32
    %42 = vector.broadcast %cst_14 : f32 to vector<8x1xf32>
    %43 = arith.maximumf %41, %42 : vector<8x1xf32>
    %44 = arith.mulf %38, %33 : vector<8x1xf32>
    %45 = math.rsqrt %44 : vector<8x1xf32>
    %46 = arith.mulf %25, %45 : vector<8x1xf32>
    %47 = arith.mulf %43, %33 : vector<8x1xf32>
    %48 = math.rsqrt %47 : vector<8x1xf32>
    %49 = arith.mulf %28, %48 : vector<8x1xf32>
    %50 = arith.subf %22, %17 : vector<8x32xf32>
    %51 = math.absf %50 : vector<8x32xf32>
    %52 = math.absf %17 : vector<8x32xf32>
    %cst_15 = arith.constant 9.99999974E-6 : f32
    %53 = vector.broadcast %cst_15 : f32 to vector<8x32xf32>
    %54 = arith.mulf %53, %52 : vector<8x32xf32>
    %cst_16 = arith.constant 9.99999993E-9 : f32
    %55 = vector.broadcast %cst_16 : f32 to vector<8x32xf32>
    %56 = arith.addf %55, %54 : vector<8x32xf32>
    %57 = arith.cmpf ole, %51, %56 : vector<8x32xf32>
    %cst_17 = arith.constant 1.000000e+00 : f32
    %cst_18 = arith.constant 0.000000e+00 : f32
    %58 = vector.broadcast %cst_17 : f32 to vector<8x32xf32>
    %59 = vector.broadcast %cst_18 : f32 to vector<8x32xf32>
    %60 = arith.select %57, %58, %59 : vector<8x32xi1>, vector<8x32xf32>
    %cst_19 = arith.constant dense<0x7F800000> : vector<8xf32>
    %61 = vector.multi_reduction <minimumf>, %60, %cst_19 [1] : vector<8x32xf32> to vector<8xf32>
    %cst_20 = arith.constant 0.000000e+00 : f32
    %62 = vector.broadcast %cst_20 : f32 to vector<8xf32>
    %63 = arith.cmpf ogt, %61, %62 : vector<8xf32>
    %64 = vector.shape_cast %63 : vector<8xi1> to vector<8x1xi1>
    %cst_21 = arith.constant -5.000000e-01 : f32
    %cst_22 = arith.constant 5.000000e-01 : f32
    %65 = vector.broadcast %cst_21 : f32 to vector<8x1xf32>
    %66 = vector.broadcast %cst_22 : f32 to vector<8x1xf32>
    %67 = arith.select %64, %65, %66 : vector<8x1xi1>, vector<8x1xf32>
    %68 = arith.subf %67, %46 : vector<8x1xf32>
    %69 = arith.addf %68, %49 : vector<8x1xf32>
    %cst_23 = arith.constant 0.000000e+00 : f32
    %70 = vector.broadcast %cst_23 : f32 to vector<8x1xf32>
    %71 = arith.maximumf %69, %70 : vector<8x1xf32>
    %c8_i32_24 = arith.constant 8 : i32
    %72 = vector.broadcast %c8_i32_24 : i32 to vector<8x1xi32>
    %73 = arith.cmpi slt, %11, %72 : vector<8x1xi32>
    %cst_25 = arith.constant 0.000000e+00 : f32
    %74 = vector.broadcast %cst_25 : f32 to vector<8x1xf32>
    %75 = arith.select %73, %71, %74 : vector<8x1xi1>, vector<8x1xf32>
    %c0_26 = arith.constant 0 : index
    %c0_27 = arith.constant 0 : index
    %76 = vector.load %arg6[%c0_26, %c0_27] : memref<1x1xf32, #tpu.memory_space<vmem>>, vector<1x1xf32>
    %cst_28 = arith.constant dense<0.000000e+00> : vector<1xf32>
    %77 = vector.multi_reduction <add>, %75, %cst_28 [0] : vector<8x1xf32> to vector<1xf32>
    %78 = vector.shape_cast %77 : vector<1xf32> to vector<1x1xf32>
    %79 = arith.addf %76, %78 : vector<1x1xf32>
    %c0_29 = arith.constant 0 : index
    %c0_30 = arith.constant 0 : index
    %80 = vector.load %arg6[%c0_29, %c0_30] : memref<1x1xf32, #tpu.memory_space<vmem>>, vector<1x1xf32>
    tpu.vector_store %arg6[%c0_29, %c0_30], %79 {strides = array<i32>} : memref<1x1xf32, #tpu.memory_space<vmem>>, vector<1x1xf32>,
    %c0_i32_31 = arith.constant 0 : i32
    %81 = arith.cmpi eq, %arg1, %c0_i32_31 : i32
    %82 = arith.extui %81 : i1 to i32
    %c0_i32_32 = arith.constant 0 : i32
    %83 = arith.cmpi ne, %82, %c0_i32_32 : i32
    scf.if %83 {
      %c0_33 = arith.constant 0 : index
      %c0_34 = arith.constant 0 : index
      %84 = vector.load %arg6[%c0_33, %c0_34] : memref<1x1xf32, #tpu.memory_space<vmem>>, vector<1x1xf32>
      %c0_35 = arith.constant 0 : index
      %c0_36 = arith.constant 0 : index
      %85 = vector.load %arg5[%c0_35, %c0_36] : memref<1x1xf32, #tpu.memory_space<vmem>>, vector<1x1xf32>
      tpu.vector_store %arg5[%c0_35, %c0_36], %84 {strides = array<i32>} : memref<1x1xf32, #tpu.memory_space<vmem>>, vector<1x1xf32>,
    } else {
    }
    return
  }
  func.func @transform_0(%arg0: i32, %arg1: i32) -> (i32, i32) {
    %c1_i32 = arith.constant 1 : i32
    %0 = arith.muli %arg0, %c1_i32 : i32
    %1 = arith.addi %0, %arg1 : i32
    %c0_i32 = arith.constant 0 : i32
    %c0_i32_0 = arith.constant 0 : i32
    return %1, %c0_i32 : i32, i32
  }
  func.func @transform_1(%arg0: i32, %arg1: i32) -> (i32, i32) {
    %c0_i32 = arith.constant 0 : i32
    %c0_i32_0 = arith.constant 0 : i32
    %c0_i32_1 = arith.constant 0 : i32
    return %c0_i32, %c0_i32_0 : i32, i32
  }
  func.func @transform_2(%arg0: i32, %arg1: i32) -> (i32, i32) {
    %c1_i32 = arith.constant 1 : i32
    %0 = arith.muli %arg0, %c1_i32 : i32
    %1 = arith.addi %0, %arg1 : i32
    %c0_i32 = arith.constant 0 : i32
    %c0_i32_0 = arith.constant 0 : i32
    return %1, %c0_i32 : i32, i32
  }
  func.func @transform_3(%arg0: i32, %arg1: i32) -> (i32, i32) {
    %c0_i32 = arith.constant 0 : i32
    %c0_i32_0 = arith.constant 0 : i32
    return %arg0, %c0_i32 : i32, i32
  }
}

</mosaic_0001>

<bundles_post_ra>
// kernel: tpu_custom_call.1
= control target key start
LH: loop header
LB: loop body
LE: loop exit
PB: predicated region body
PF: predicated region fallthrough
CT: control target
= control target key end

     0   :  { %8 = vsyncpa [#allocation4], 0  ;;  %s443_s0 = inlined_call_operand.vmem [shape: f32[8,32], index: 0, kind: input, shape index: {}]   ;;  %s444_s1 = inlined_call_operand.hbm [shape: f32[8,32], index: 1, kind: input, shape index: {}]   ;;  %s445_s2 = inlined_call_operand.vmem [shape: s32[8,1], index: 2, kind: input, shape index: {}]   ;;  %s446_s3 = inlined_call_operand.hbm [shape: f32[1,1], index: 3, kind: output, shape index: {}]  }
   0x1   :  { %9 = vsyncpa [#allocation5], 0  ;;  %s396_s12 = smov [#allocation3]  }
   0x2   :  { %s24_s13 = sshll.u32 %s396_s12, 4  ;;  %s25_s13 = int_to_ptr.vmem [resolvable:$true] %s24_s13 }
   0x3   :  { %s360_s14 = scalar_lea.vmem %s25_s13, 128  ;;  %p365_p1 = scmp.lt.s32.totalorder %s25_s13, %s25_s13 }
   0x4   :  { %p361_p0 = scmp.ne.s32.totalorder %s25_s13, %s360_s14  ;;  %p366_p2 = scmp.lt.s32.totalorder %s360_s14, %s360_s14 }
   0x6   :  { %p367_p3 = por %p366_p2, %p365_p1 }
   0x8   :  { %p368_p4 = pnand %p367_p3, %p361_p0 }
   0xa   :  { %371 = shalt.err (!%p368_p4)
}
   0xb   :  { %27 = dma.hbm_to_vmem [thread:$0]  %s444_s1, 128, %s25_s13, [#allocation4]  }
   0xc   :  { %392 = dma.done.wait [#allocation4], 128  }
   0xd   :  { %393 = vsyncadd [#allocation4], 4294967168  ;;  %v72_v0 = vlaneseq  ;;  %v397_v1 = vmov 0   ;;  %v398_v2 = vmov 0.0   ;;  %vm399_vm0 = vmmov 0   ;;  %v69_v6 = vld [vmem:[%s445_s2] sm:$0xff] }
   0xe   :  { %347 = vset.pattern.permute.xlu0 %v397_v1  ;;  %331 = vmatprep.subr.mxu0 %v398_v2  ;;  %vm81_vm2 = vcmask 64512   ;;  %v68_v7 = vld [vmem:[#allocation3] sm:$0xff]  ;;  %vm235_vm3 = vcmask 261120   ;;  %vm65_vm6 = vcmask 0   ;;  %v400_v43 = vmov 0.5  }
   0xf   :  { %333 = vmatprep.mubr.msk.f32.mxu0 %vm399_vm0, %v398_v2  ;;  %v73_v3 = vshrl.u32 %v72_v0, 7  ;;  %v77_v4 = vand.u32 127, %v72_v0  ;;  %336 = vmatprep.subr.mxu1 %v398_v2  ;;  %v67_v8 = vld [vmem:[%s443_s0] sm:$0xff]  ;;  %66 = vst.msk [vmem:[#allocation2] sm:$0x1] %vm65_vm6, %v398_v2  ;;  %s401_s0 = smov [#allocation6]  }
  0x10   :  { %338 = vmatprep.mubr.msk.f32.mxu1 %vm399_vm0, %v398_v2  ;;  %156 = vperm.xlu0 %347, %v69_v6   ;;  %v243_v9 = vmul.f32 %v67_v8, %v67_v8  ;;  %s302_s2 = sshll.u32 %s401_s0, 4  ;;  %s303_s2 = int_to_ptr.vmem [resolvable:$true] %s302_s2 }
  0x11   :  { %vm78_vm1 = vcmp.eq.s32.totalorder %v77_v4, %v73_v3  ;;  %332 = vmatpush3.msra.mxu0 %v68_v7  ;;  %337 = vmatpush3.msra.mxu1 %v68_v7  ;;  %s372_s20 = scalar_lea.vmem %s303_s2, 16  ;;  %s376_s21 = scalar_lea.vmem %s303_s2, 32 }
  0x12   :  { %v323_v5 = vsel %vm78_vm1, 1.0, %v398_v2  ;;  %v244_v10 = vsel %vm235_vm3, %v243_v9, 0.0  ;;  %p373_p5 = scmp.ne.s32.totalorder %s303_s2, %s372_s20  ;;  %p377_p6 = scmp.lt.s32.totalorder %s303_s2, %s303_s2 }
  0x13   :  { %334 = vmatmul.mubr.msk.f32.vlgmr.msra.gmra.mxu0 %vm81_vm2, %v323_v5  ;;  %p378_p7 = scmp.lt.s32.totalorder %s376_s21, %s372_s20 }
  0x15   :  { %p379_p8 = por %p378_p7, %p377_p6 }
  0x16   :  { %v281_v57 = vld [vmem:[#allocation2] sm:$0x1] }
  0x17   :  { %p380_p9 = pnand %p379_p8, %p373_p5 }
  0x2f   :  { %245 = vadd.xlane.f32.xlu0 %v244_v10 }
  0x8b   :  { %v157_v11 = vpop.permute.xlu0 %156 }
  0x8c   :  { %vm158_vm4 = vcmp.eq.s32.totalorder %v77_v4, %v157_v11 }
  0x8d   :  { %v325_v12 = vsel %vm158_vm4, 1.0, %v398_v2 }
  0x8e   :  { %339 = vmatmul.mubr.msk.f32.vlgmr.msra.gmra.mxu1 %vm81_vm2, %v325_v12 }
  0xb8   :  { %v246_v33 = vpop.xlane.xlu0 %245 }
  0xb9   :  { %v247_v35 = vmax.f32 %v246_v33, 1e-12 }
  0xd3   :  { %v151_v13 = vpop.f32.mrf.mxu0 }
  0xd4   :  { %v248_v14 = vmul.f32 %v151_v13, %v151_v13  ;;  %v266_v17 = vand.u32 2147483647, %v151_v13  ;;  %v234_v25 = vmul.f32 %v151_v13, %v67_v8 }
  0xd5   :  { %v335_v15 = vpop.f32.mrf.mxu0 }
  0xd6   :  { %v249_v16 = vsel %vm235_vm3, %v248_v14, 0.0  ;;  %v267_v18 = vmul.f32 1e-05, %v266_v17  ;;  %v236_v27 = vsel %vm235_vm3, %v234_v25, 0.0 }
  0xd7   :  { %250 = vadd.xlane.f32.xlu1 %v249_v16 }
  0xd8   :  { %v268_v26 = vadd.f32 1e-08, %v267_v18 }
 0x14e   :  { %v230_v19 = vpop.f32.mrf.mxu1 }
 0x14f   :  { %v264_v20 = vsub.f32 %v230_v19, %v151_v13  ;;  %v253_v21 = vmul.f32 %v230_v19, %v230_v19  ;;  %v239_v30 = vmul.f32 %v230_v19, %v67_v8 }
 0x150   :  { %v340_v22 = vpop.f32.mrf.mxu1 }
 0x151   :  { %v265_v23 = vand.u32 2147483647, %v264_v20  ;;  %v254_v24 = vsel %vm235_vm3, %v253_v21, 0.0  ;;  %v240_v31 = vsel %vm235_vm3, %v239_v30, 0.0 }
 0x152   :  { %255 = vadd.xlane.f32.xlu1 %v254_v24 }
 0x153   :  { %vm269_vm5 = vcmp.le.f32.partialorder %v265_v23, %v268_v26 }
 0x154   :  { %v270_v28 = vsel %vm269_vm5, 1.0, %v398_v2 }
 0x155   :  { %v271_v29 = vsel %vm235_vm3, %v270_v28, inf }
 0x156   :  { %237 = vadd.xlane.f32.xlu1 %v236_v27 }
 0x15a   :  { %272 = vmin.xlane.f32.xlu1 %v271_v29 }
 0x15e   :  { %241 = vadd.xlane.f32.xlu1 %v240_v31 }
 0x160   :  { %v251_v32 = vpop.xlane.xlu1 %250 }
 0x161   :  { %v252_v34 = vmax.f32 %v251_v32, 1e-12 }
 0x163   :  { %v258_v36 = vmul.f32 %v252_v34, %v247_v35 }
 0x165   :  { %348 = vrsqrt.f32 %v258_v36 }
 0x172   :  { %v349_v42 = vpop.eup %348 }
 0x1db   :  { %v256_v37 = vpop.xlane.xlu1 %255 }
 0x1dc   :  { %v257_v38 = vmax.f32 %v256_v37, 1e-12 }
 0x1de   :  { %v261_v39 = vmul.f32 %v257_v38, %v247_v35 }
 0x1df   :  { %v238_v40 = vpop.xlane.xlu1 %237 }
 0x1e0   :  { %350 = vrsqrt.f32 %v261_v39  ;;  %v260_v45 = vmul.f32 %v349_v42, %v238_v40 }
 0x1e3   :  { %v273_v41 = vpop.xlane.xlu1 %272 }
 0x1e4   :  { %vm274_vm7 = vcmp.gt.f32.partialorder %v273_v41, 0.0 }
 0x1e5   :  { %v275_v44 = vsel %vm274_vm7, -0.5, %v400_v43 }
 0x1e6   :  { %v276_v48 = vsub.f32 %v275_v44, %v260_v45 }
 0x1e7   :  { %v242_v47 = vpop.xlane.xlu1 %241 }
 0x1ed   :  { %v351_v46 = vpop.eup %350 }
 0x1ee   :  { %v263_v49 = vmul.f32 %v351_v46, %v242_v47 }
 0x1f0   :  { %v277_v50 = vadd.f32 %v276_v48, %v263_v49 }
 0x1f2   :  { %v278_v51 = vmax.f32 %v277_v50, 0.0 }
 0x1f4   :  { %v282_v52 = vrot.slane %v278_v51, 4 }
 0x1f6   :  { %v283_v53 = vadd.f32 %v282_v52, %v278_v51 }
 0x1f8   :  { %v284_v54 = vrot.slane %v283_v53, 2 }
 0x1fa   :  { %v285_v55 = vadd.f32 %v284_v54, %v283_v53 }
 0x1fc   :  { %v286_v56 = vrot.slane %v285_v55, 1 }
 0x1fe   :  { %v287_v58 = vadd.f32 %v286_v56, %v285_v55 }
 0x200   :  { %v288_v59 = vadd.f32 %v287_v58, %v281_v57 }
 0x202   :  { %290 = vst.msk [vmem:[#allocation2] sm:$0x1] %vm65_vm6, %v288_v59 }
 0x209   :  { %v294_v60 = vld [vmem:[#allocation2] sm:$0x1] }
 0x20a   :  { %295 = vst.msk [vmem:[#allocation6] sm:$0x1] %vm65_vm6, %v294_v60 }
 0x20b   :  { %383 = shalt.err (!%p380_p9)
}
 0x20c   :  { %305 = dma.vmem_to_hbm [thread:$0]  %s303_s2, 16, %s446_s3, [#allocation5]  }
 0x20d   :  { %394 = dma.done.wait [#allocation5], 16  }
 0x20e   :  { %395 = vsyncadd [#allocation5], 4294967280 }
 0x20f   :  { %309 = vsyncpa [#allocation4], 1 }
 0x210   :  { %310 = vsyncpa [#allocation5], 1 }

</bundles_post_ra>
